<compile_context>
chip_gen: v5e
topology: v5e:2x2
jax: 0.10.0
libtpu: 0.0.40
codegen_flags: <defaults>
</compile_context>

<pallas_src>
import functools
import math

import jax
import jax.numpy as jnp
from jax.experimental import pallas as pl
from jax.experimental.pallas import tpu as pltpu

LANES = 128


def _round_up(v, m):
    return ((v + m - 1) // m) * m


def _pad2(x, rows, cols):
    return jnp.pad(x, ((0, rows - x.shape[0]), (0, cols - x.shape[1])))


# ----------------------------------------------------------------------------
# Pallas kernel: one GCN layer, tiled over (row tiles, K tiles)
# ----------------------------------------------------------------------------
def _gcn_layer_kernel(a_ref, x_ref, w_ref, b_ref, o_ref, acc_ref, *, apply_relu):
    k = pl.program_id(1)

    @pl.when(k == 0)
    def _init():
        acc_ref[...] = jnp.zeros_like(acc_ref)

    # Feature transform for this K-tile of nodes: (tk, Cin_p) @ (Cin_p, Cout_p)
    xw = jnp.dot(x_ref[...], w_ref[...], preferred_element_type=jnp.float32)
    # Aggregation: (tm, tk) @ (tk, Cout_p), bf16 MXU inputs, f32 accumulate.
    acc_ref[...] += jnp.dot(
        a_ref[...], xw.astype(jnp.bfloat16), preferred_element_type=jnp.float32
    )

    @pl.when(k == pl.num_programs(1) - 1)
    def _finalize():
        out = acc_ref[...] + b_ref[...]
        if apply_relu:
            out = jnp.maximum(out, 0.0)
        o_ref[...] = out.astype(o_ref.dtype)


def _gcn_layer(a_hat, x, w, b, *, apply_relu, out_dtype, tm=128, tk=128):
    """out = A_hat @ (x @ w) + b, optional ReLU.  All dims already padded."""
    n = a_hat.shape[0]
    c_in = x.shape[1]
    c_out = w.shape[1]
    assert n % tm == 0 and n % tk == 0
    assert c_in % LANES == 0 and c_out % LANES == 0
    grid = (n // tm, n // tk)

    flops = 2 * n * c_in * c_out + 2 * n * n * c_out
    bytes_accessed = (
        a_hat.size * a_hat.dtype.itemsize
        + (n // tm) * x.size * x.dtype.itemsize
        + w.size * w.dtype.itemsize
        + b.size * b.dtype.itemsize
        + n * c_out * jnp.dtype(out_dtype).itemsize
    )

    kernel = functools.partial(_gcn_layer_kernel, apply_relu=apply_relu)
    return pl.pallas_call(
        kernel,
        out_shape=jax.ShapeDtypeStruct((n, c_out), out_dtype),
        grid_spec=pltpu.PrefetchScalarGridSpec(
            num_scalar_prefetch=0,
            grid=grid,
            in_specs=[
                pl.BlockSpec((tm, tk), lambda i, k: (i, k)),        # A_hat tile
                pl.BlockSpec((tk, c_in), lambda i, k: (k, 0)),      # X rows (K tile)
                pl.BlockSpec((c_in, c_out), lambda i, k: (0, 0)),   # W (resident)
                pl.BlockSpec((1, c_out), lambda i, k: (0, 0)),      # bias (resident)
            ],
            out_specs=pl.BlockSpec((tm, c_out), lambda i, k: (i, 0)),
            scratch_shapes=[pltpu.VMEM((tm, c_out), jnp.float32)],
        ),
        compiler_params=pltpu.CompilerParams(
            dimension_semantics=("parallel", "arbitrary"),
        ),
        cost_estimate=pl.CostEstimate(
            flops=flops, transcendentals=0, bytes_accessed=bytes_accessed
        ),
    )(a_hat, x, w, b)


# ----------------------------------------------------------------------------
# Two-layer GNN forward (GCN): relu(A (X W1) + b1) -> dropout(eval) -> A (H W2) + b2
# ----------------------------------------------------------------------------
def gnn_forward(a_hat, x, w1, b1, w2, b2, *, tm=128, tk=128):
    n, c_in = x.shape
    c_hid = w1.shape[1]
    c_out = w2.shape[1]

    n_pad = _round_up(n, math.lcm(tm, tk))
    c_in_p = _round_up(c_in, LANES)
    c_hid_p = _round_up(c_hid, LANES)
    c_out_p = _round_up(c_out, LANES)

    # Cast A_hat to bf16 ONCE (largest operand); lane-pad all channel dims.
    a_p = _pad2(a_hat, n_pad, n_pad).astype(jnp.bfloat16)
    x_p = _pad2(x, n_pad, c_in_p).astype(jnp.bfloat16)
    w1_p = _pad2(w1, c_in_p, c_hid_p).astype(jnp.bfloat16)
    b1_p = _pad2(b1.reshape(1, -1), 1, c_hid_p).astype(jnp.float32)
    w2_p = _pad2(w2, c_hid_p, c_out_p).astype(jnp.bfloat16)
    b2_p = _pad2(b2.reshape(1, -1), 1, c_out_p).astype(jnp.float32)

    # Layer 1: H = relu(A (X W1) + b1), stored lane-dense bf16.
    h = _gcn_layer(a_p, x_p, w1_p, b1_p, apply_relu=True,
                   out_dtype=jnp.bfloat16, tm=tm, tk=tk)
    # Dropout(p=0.1): identity in eval mode.
    # Layer 2: out = A (H W2) + b2, f32 output.
    out = _gcn_layer(a_p, h, w2_p, b2_p, apply_relu=False,
                     out_dtype=jnp.float32, tm=tm, tk=tk)
    return out[:n, :c_out]


# ----------------------------------------------------------------------------
# Plain-JAX glue & references
# ----------------------------------------------------------------------------
def build_normalized_adjacency(edge_index, edge_weight, num_nodes):
    """Dense GCN-normalized adjacency with self-loops (PyG GCNConv semantics)."""
    src = edge_index[0]
    dst = edge_index[1]
    adj = jnp.zeros((num_nodes, num_nodes), dtype=jnp.float32)
    adj = adj.at[dst, src].add(edge_weight.astype(jnp.float32))
    adj = adj + jnp.eye(num_nodes, dtype=jnp.float32)
    deg = adj.sum(axis=1)
    deg_inv_sqrt = jnp.where(deg > 0, 1.0 / jnp.sqrt(deg), 0.0)
    return deg_inv_sqrt[:, None] * adj * deg_inv_sqrt[None, :]


def reference_forward_f32(a_hat, x, w1, b1, w2, b2):
    h = jnp.maximum(a_hat @ (x @ w1) + b1, 0.0)
    return a_hat @ (h @ w2) + b2


def reference_forward_bf16(a_hat, x, w1, b1, w2, b2):
    """Mirrors the kernel's bf16-operand / f32-accumulate math."""
    a_bf = a_hat.astype(jnp.bfloat16)
    xw = jnp.dot(x.astype(jnp.bfloat16), w1.astype(jnp.bfloat16),
                 preferred_element_type=jnp.float32).astype(jnp.bfloat16)
    h = jnp.dot(a_bf, xw, preferred_element_type=jnp.float32) + b1
    h = jnp.maximum(h, 0.0).astype(jnp.bfloat16)
    hw = jnp.dot(h, w2.astype(jnp.bfloat16),
                 preferred_element_type=jnp.float32).astype(jnp.bfloat16)
    return jnp.dot(a_bf, hw, preferred_element_type=jnp.float32) + b2


if __name__ == "__main__":
    key = jax.random.PRNGKey(0)

    # Small synthetic graph / feature sizes (channels match the module spec).
    num_nodes = 256          # multiple of the 128 tile -> 2x2 grid per layer
    in_channels = 16
    hidden_channels = 32
    out_channels = 8
    num_edges = 1024

    k_x, k_src, k_dst, k_w, k_w1, k_w2 = jax.random.split(key, 6)

    x = jax.random.normal(k_x, (num_nodes, in_channels), dtype=jnp.float32)
    src = jax.random.randint(k_src, (num_edges,), 0, num_nodes, dtype=jnp.int32)
    dst = jax.random.randint(k_dst, (num_edges,), 0, num_nodes, dtype=jnp.int32)
    edge_index = jnp.stack([src, dst], axis=0)
    edge_weight = jax.random.uniform(
        k_w, (num_edges,), dtype=jnp.float32, minval=0.5, maxval=1.5
    )

    def glorot(k, shape):
        fan_in, fan_out = shape
        scale = jnp.sqrt(6.0 / (fan_in + fan_out))
        return jax.random.uniform(k, shape, jnp.float32, -scale, scale)

    w1 = glorot(k_w1, (in_channels, hidden_channels))
    b1 = jnp.zeros((1, hidden_channels), dtype=jnp.float32)
    w2 = glorot(k_w2, (hidden_channels, out_channels))
    b2 = jnp.zeros((1, out_channels), dtype=jnp.float32)

    # Glue: build dense normalized adjacency in plain JAX.
    a_hat = build_normalized_adjacency(edge_index, edge_weight, num_nodes)

    out = jax.jit(gnn_forward)(a_hat, x, w1, b1, w2, b2)
    out = jax.block_until_ready(out)
    assert out.shape == (num_nodes, out_channels)

    # Tight check vs a reference that mirrors the kernel's bf16/f32 math.
    ref_bf16 = reference_forward_bf16(a_hat, x, w1, b1, w2, b2)
    assert jnp.allclose(out, ref_bf16, atol=1e-2, rtol=1e-2), (
        float(jnp.max(jnp.abs(out - ref_bf16)))
    )
    # Loose check vs the full-f32 reference (bf16 quantization tolerance).
    ref_f32 = reference_forward_f32(a_hat, x, w1, b1, w2, b2)
    assert jnp.allclose(out, ref_f32, atol=5e-2, rtol=5e-2), (
        float(jnp.max(jnp.abs(out - ref_f32)))
    )

    print("KERNEL_OK")
</pallas_src>

<mosaic_0001>
module attributes {stable_mosaic.version = 11 : i64} {
  func.func @_gcn_layer_kernel(%arg0: i32, %arg1: i32, %arg2: memref<128x128xbf16, #tpu.memory_space<vmem>>, %arg3: memref<128x128xbf16, #tpu.memory_space<vmem>>, %arg4: memref<128x128xbf16, #tpu.memory_space<vmem>>, %arg5: memref<1x128xf32, #tpu.memory_space<vmem>>, %arg6: memref<128x128xbf16, #tpu.memory_space<vmem>>, %arg7: memref<128x128xf32, #tpu.memory_space<vmem>>) attributes {dimension_semantics = [#tpu.dimension_semantics<parallel>, #tpu.dimension_semantics<arbitrary>], iteration_bounds = array<i64: 2, 2>, scalar_prefetch = 0 : i64, scratch_operands = 1 : i64, tpu.core_type = #tpu.core_type<tc>, window_params = [{transform_indices = @transform_0, window_bounds = array<i64: 128, 128>}, {transform_indices = @transform_1, window_bounds = array<i64: 128, 128>}, {pipeline_mode = #tpu.pipeline_mode<synchronous>, transform_indices = @transform_2, window_bounds = array<i64: 128, 128>}, {pipeline_mode = #tpu.pipeline_mode<synchronous>, transform_indices = @transform_3, window_bounds = array<i64: 1, 128>}, {transform_indices = @transform_4, window_bounds = array<i64: 128, 128>}]} {
    %c0_i32 = arith.constant 0 : i32
    %0 = arith.cmpi eq, %arg1, %c0_i32 : i32
    %1 = arith.extui %0 : i1 to i32
    %c0_i32_0 = arith.constant 0 : i32
    %2 = arith.cmpi ne, %1, %c0_i32_0 : i32
    scf.if %2 {
      %cst_12 = arith.constant 0.000000e+00 : f32
      %15 = vector.broadcast %cst_12 : f32 to vector<128x128xf32>
      %c0_13 = arith.constant 0 : index
      %c0_14 = arith.constant 0 : index
      %16 = vector.load %arg7[%c0_13, %c0_14] : memref<128x128xf32, #tpu.memory_space<vmem>>, vector<128x128xf32>
      tpu.vector_store %arg7[%c0_13, %c0_14], %15 {strides = array<i32>} : memref<128x128xf32, #tpu.memory_space<vmem>>, vector<128x128xf32>,
    } else {
    }
    %c0 = arith.constant 0 : index
    %c0_1 = arith.constant 0 : index
    %3 = vector.load %arg3[%c0, %c0_1] : memref<128x128xbf16, #tpu.memory_space<vmem>>, vector<128x128xbf16>
    %c0_2 = arith.constant 0 : index
    %c0_3 = arith.constant 0 : index
    %4 = vector.load %arg4[%c0_2, %c0_3] : memref<128x128xbf16, #tpu.memory_space<vmem>>, vector<128x128xbf16>
    %cst = arith.constant dense<0.000000e+00> : vector<128x128xf32>
    %5 = tpu.matmul %3, %4, %cst {dimension_numbers = #tpu.dot_dimension_numbers<[1], [0], [0], [1], [0, 0, 1, 1], [], []>} : vector<128x128xbf16>, vector<128x128xbf16>, vector<128x128xf32> -> vector<128x128xf32>
    %c0_4 = arith.constant 0 : index
    %c0_5 = arith.constant 0 : index
    %6 = vector.load %arg7[%c0_4, %c0_5] : memref<128x128xf32, #tpu.memory_space<vmem>>, vector<128x128xf32>
    %c0_6 = arith.constant 0 : index
    %c0_7 = arith.constant 0 : index
    %7 = vector.load %arg2[%c0_6, %c0_7] : memref<128x128xbf16, #tpu.memory_space<vmem>>, vector<128x128xbf16>
    %8 = arith.truncf %5 : vector<128x128xf32> to vector<128x128xbf16>
    %cst_8 = arith.constant dense<0.000000e+00> : vector<128x128xf32>
    %9 = tpu.matmul %7, %8, %cst_8 {dimension_numbers = #tpu.dot_dimension_numbers<[1], [0], [0], [1], [0, 0, 1, 1], [], []>} : vector<128x128xbf16>, vector<128x128xbf16>, vector<128x128xf32> -> vector<128x128xf32>
    %10 = arith.addf %6, %9 : vector<128x128xf32>
    %c0_9 = arith.constant 0 : index
    %c0_10 = arith.constant 0 : index
    %11 = vector.load %arg7[%c0_9, %c0_10] : memref<128x128xf32, #tpu.memory_space<vmem>>, vector<128x128xf32>
    tpu.vector_store %arg7[%c0_9, %c0_10], %10 {strides = array<i32>} : memref<128x128xf32, #tpu.memory_space<vmem>>, vector<128x128xf32>,
    %c1_i32 = arith.constant 1 : i32
    %12 = arith.cmpi eq, %arg1, %c1_i32 : i32
    %13 = arith.extui %12 : i1 to i32
    %c0_i32_11 = arith.constant 0 : i32
    %14 = arith.cmpi ne, %13, %c0_i32_11 : i32
    scf.if %14 {
      %c0_12 = arith.constant 0 : index
      %c0_13 = arith.constant 0 : index
      %15 = vector.load %arg7[%c0_12, %c0_13] : memref<128x128xf32, #tpu.memory_space<vmem>>, vector<128x128xf32>
      %c0_14 = arith.constant 0 : index
      %c0_15 = arith.constant 0 : index
      %16 = vector.load %arg5[%c0_14, %c0_15] : memref<1x128xf32, #tpu.memory_space<vmem>>, vector<1x128xf32>
      %17 = vector.broadcast %16 : vector<1x128xf32> to vector<128x128xf32>
      %18 = arith.addf %15, %17 : vector<128x128xf32>
      %cst_16 = arith.constant 0.000000e+00 : f32
      %19 = vector.broadcast %cst_16 : f32 to vector<128x128xf32>
      %20 = arith.maximumf %18, %19 : vector<128x128xf32>
      %21 = arith.truncf %20 : vector<128x128xf32> to vector<128x128xbf16>
      %c0_17 = arith.constant 0 : index
      %c0_18 = arith.constant 0 : index
      %22 = vector.load %arg6[%c0_17, %c0_18] : memref<128x128xbf16, #tpu.memory_space<vmem>>, vector<128x128xbf16>
      tpu.vector_store %arg6[%c0_17, %c0_18], %21 {strides = array<i32>} : memref<128x128xbf16, #tpu.memory_space<vmem>>, vector<128x128xbf16>,
    } else {
    }
    return
  }
  func.func @transform_0(%arg0: i32, %arg1: i32) -> (i32, i32) {
    %c0_i32 = arith.constant 0 : i32
    return %arg0, %arg1 : i32, i32
  }
  func.func @transform_1(%arg0: i32, %arg1: i32) -> (i32, i32) {
    %c0_i32 = arith.constant 0 : i32
    %c0_i32_0 = arith.constant 0 : i32
    return %arg1, %c0_i32 : i32, i32
  }
  func.func @transform_2(%arg0: i32, %arg1: i32) -> (i32, i32) {
    %c0_i32 = arith.constant 0 : i32
    %c0_i32_0 = arith.constant 0 : i32
    %c0_i32_1 = arith.constant 0 : i32
    return %c0_i32, %c0_i32_0 : i32, i32
  }
  func.func @transform_3(%arg0: i32, %arg1: i32) -> (i32, i32) {
    %c0_i32 = arith.constant 0 : i32
    %c0_i32_0 = arith.constant 0 : i32
    %c0_i32_1 = arith.constant 0 : i32
    return %c0_i32, %c0_i32_0 : i32, i32
  }
  func.func @transform_4(%arg0: i32, %arg1: i32) -> (i32, i32) {
    %c0_i32 = arith.constant 0 : i32
    %c0_i32_0 = arith.constant 0 : i32
    return %arg0, %c0_i32 : i32, i32
  }
}

module attributes {stable_mosaic.version = 11 : i64} {
  func.func @_gcn_layer_kernel(%arg0: i32, %arg1: i32, %arg2: memref<128x128xbf16, #tpu.memory_space<vmem>>, %arg3: memref<128x128xbf16, #tpu.memory_space<vmem>>, %arg4: memref<128x128xbf16, #tpu.memory_space<vmem>>, %arg5: memref<1x128xf32, #tpu.memory_space<vmem>>, %arg6: memref<128x128xf32, #tpu.memory_space<vmem>>, %arg7: memref<128x128xf32, #tpu.memory_space<vmem>>) attributes {dimension_semantics = [#tpu.dimension_semantics<parallel>, #tpu.dimension_semantics<arbitrary>], iteration_bounds = array<i64: 2, 2>, scalar_prefetch = 0 : i64, scratch_operands = 1 : i64, tpu.core_type = #tpu.core_type<tc>, window_params = [{transform_indices = @transform_0, window_bounds = array<i64: 128, 128>}, {transform_indices = @transform_1, window_bounds = array<i64: 128, 128>}, {pipeline_mode = #tpu.pipeline_mode<synchronous>, transform_indices = @transform_2, window_bounds = array<i64: 128, 128>}, {pipeline_mode = #tpu.pipeline_mode<synchronous>, transform_indices = @transform_3, window_bounds = array<i64: 1, 128>}, {transform_indices = @transform_4, window_bounds = array<i64: 128, 128>}]} {
    %c0_i32 = arith.constant 0 : i32
    %0 = arith.cmpi eq, %arg1, %c0_i32 : i32
    %1 = arith.extui %0 : i1 to i32
    %c0_i32_0 = arith.constant 0 : i32
    %2 = arith.cmpi ne, %1, %c0_i32_0 : i32
    scf.if %2 {
      %cst_12 = arith.constant 0.000000e+00 : f32
      %15 = vector.broadcast %cst_12 : f32 to vector<128x128xf32>
      %c0_13 = arith.constant 0 : index
      %c0_14 = arith.constant 0 : index
      %16 = vector.load %arg7[%c0_13, %c0_14] : memref<128x128xf32, #tpu.memory_space<vmem>>, vector<128x128xf32>
      tpu.vector_store %arg7[%c0_13, %c0_14], %15 {strides = array<i32>} : memref<128x128xf32, #tpu.memory_space<vmem>>, vector<128x128xf32>,
    } else {
    }
    %c0 = arith.constant 0 : index
    %c0_1 = arith.constant 0 : index
    %3 = vector.load %arg3[%c0, %c0_1] : memref<128x128xbf16, #tpu.memory_space<vmem>>, vector<128x128xbf16>
    %c0_2 = arith.constant 0 : index
    %c0_3 = arith.constant 0 : index
    %4 = vector.load %arg4[%c0_2, %c0_3] : memref<128x128xbf16, #tpu.memory_space<vmem>>, vector<128x128xbf16>
    %cst = arith.constant dense<0.000000e+00> : vector<128x128xf32>
    %5 = tpu.matmul %3, %4, %cst {dimension_numbers = #tpu.dot_dimension_numbers<[1], [0], [0], [1], [0, 0, 1, 1], [], []>} : vector<128x128xbf16>, vector<128x128xbf16>, vector<128x128xf32> -> vector<128x128xf32>
    %c0_4 = arith.constant 0 : index
    %c0_5 = arith.constant 0 : index
    %6 = vector.load %arg7[%c0_4, %c0_5] : memref<128x128xf32, #tpu.memory_space<vmem>>, vector<128x128xf32>
    %c0_6 = arith.constant 0 : index
    %c0_7 = arith.constant 0 : index
    %7 = vector.load %arg2[%c0_6, %c0_7] : memref<128x128xbf16, #tpu.memory_space<vmem>>, vector<128x128xbf16>
    %8 = arith.truncf %5 : vector<128x128xf32> to vector<128x128xbf16>
    %cst_8 = arith.constant dense<0.000000e+00> : vector<128x128xf32>
    %9 = tpu.matmul %7, %8, %cst_8 {dimension_numbers = #tpu.dot_dimension_numbers<[1], [0], [0], [1], [0, 0, 1, 1], [], []>} : vector<128x128xbf16>, vector<128x128xbf16>, vector<128x128xf32> -> vector<128x128xf32>
    %10 = arith.addf %6, %9 : vector<128x128xf32>
    %c0_9 = arith.constant 0 : index
    %c0_10 = arith.constant 0 : index
    %11 = vector.load %arg7[%c0_9, %c0_10] : memref<128x128xf32, #tpu.memory_space<vmem>>, vector<128x128xf32>
    tpu.vector_store %arg7[%c0_9, %c0_10], %10 {strides = array<i32>} : memref<128x128xf32, #tpu.memory_space<vmem>>, vector<128x128xf32>,
    %c1_i32 = arith.constant 1 : i32
    %12 = arith.cmpi eq, %arg1, %c1_i32 : i32
    %13 = arith.extui %12 : i1 to i32
    %c0_i32_11 = arith.constant 0 : i32
    %14 = arith.cmpi ne, %13, %c0_i32_11 : i32
    scf.if %14 {
      %c0_12 = arith.constant 0 : index
      %c0_13 = arith.constant 0 : index
      %15 = vector.load %arg7[%c0_12, %c0_13] : memref<128x128xf32, #tpu.memory_space<vmem>>, vector<128x128xf32>
      %c0_14 = arith.constant 0 : index
      %c0_15 = arith.constant 0 : index
      %16 = vector.load %arg5[%c0_14, %c0_15] : memref<1x128xf32, #tpu.memory_space<vmem>>, vector<1x128xf32>
      %17 = vector.broadcast %16 : vector<1x128xf32> to vector<128x128xf32>
      %18 = arith.addf %15, %17 : vector<128x128xf32>
      %c0_16 = arith.constant 0 : index
      %c0_17 = arith.constant 0 : index
      %19 = vector.load %arg6[%c0_16, %c0_17] : memref<128x128xf32, #tpu.memory_space<vmem>>, vector<128x128xf32>
      tpu.vector_store %arg6[%c0_16, %c0_17], %18 {strides = array<i32>} : memref<128x128xf32, #tpu.memory_space<vmem>>, vector<128x128xf32>,
    } else {
    }
    return
  }
  func.func @transform_0(%arg0: i32, %arg1: i32) -> (i32, i32) {
    %c0_i32 = arith.constant 0 : i32
    return %arg0, %arg1 : i32, i32
  }
  func.func @transform_1(%arg0: i32, %arg1: i32) -> (i32, i32) {
    %c0_i32 = arith.constant 0 : i32
    %c0_i32_0 = arith.constant 0 : i32
    return %arg1, %c0_i32 : i32, i32
  }
  func.func @transform_2(%arg0: i32, %arg1: i32) -> (i32, i32) {
    %c0_i32 = arith.constant 0 : i32
    %c0_i32_0 = arith.constant 0 : i32
    %c0_i32_1 = arith.constant 0 : i32
    return %c0_i32, %c0_i32_0 : i32, i32
  }
  func.func @transform_3(%arg0: i32, %arg1: i32) -> (i32, i32) {
    %c0_i32 = arith.constant 0 : i32
    %c0_i32_0 = arith.constant 0 : i32
    %c0_i32_1 = arith.constant 0 : i32
    return %c0_i32, %c0_i32_0 : i32, i32
  }
  func.func @transform_4(%arg0: i32, %arg1: i32) -> (i32, i32) {
    %c0_i32 = arith.constant 0 : i32
    %c0_i32_0 = arith.constant 0 : i32
    return %arg0, %c0_i32 : i32, i32
  }
}

</mosaic_0001>

<bundles_post_ra>
// kernel: gnn_forward.2
= control target key start
LH: loop header
LB: loop body
LE: loop exit
PB: predicated region body
PF: predicated region fallthrough
CT: control target
= control target key end

     0   :  { %s1226_s15 = smov 0   ;;  %s1228_s16 = smov 0   ;;  %s1395_s0 = inlined_call_operand.vmem [shape: bf16[256,256], index: 0, kind: input, shape index: {}]   ;;  %s1396_s1 = inlined_call_operand.vmem [shape: bf16[256,128], index: 1, kind: input, shape index: {}]   ;;  %s1397_s2 = inlined_call_operand.vmem [shape: bf16[128,128], index: 2, kind: input, shape index: {}]   ;;  %s1398_s3 = inlined_call_operand.vmem [shape: f32[1,128], index: 3, kind: input, shape index: {}]   ;;  %s1399_s4 = inlined_call_operand.vmem [shape: bf16[256,128], index: 4, kind: output, shape index: {}]  }
   0x1   :  { %s1230_s17 = smov 0   ;;  %s1232_s18 = smov 0  }
   0x2   :  { %s1234_s19 = smov 0   ;;  %s1236_s20 = smov 0  }
   0x3   :  { %s1238_s21 = smov 0  }
   0x4 LB: > { %s23_s22 = sadd.s32 1, %s1190_s19  ;;  %s26_s23 = sadd.s32 1, %s1194_s20  ;;  %s1198_s21 = sphi %s1238_s21, %s14_s21   ;;  %s1194_s20 = sphi %s1236_s20, %s1405_s20   ;;  %s1190_s19 = sphi %s1234_s19, %s1404_s19   ;;  %s1186_s18 = sphi %s1232_s18, %s1403_s18   ;;  %s1182_s17 = sphi %s1230_s17, %s1402_s17   ;;  %s1178_s16 = sphi %s1228_s16, %s1401_s16   ;;  %s1174_s15 = sphi %s1226_s15, %s1400_s15  }
   0x5   : > { %p24_p0 = scmp.ge.s32.totalorder %s23_s22, 2  ;;  %p42_p1 = scmp.ne.s32.totalorder %s1178_s16, %s1174_s15 }
   0x6   : > { %p43_p2 = scmp.eq.s32.totalorder %s1198_s21, 0  ;;  %s35_s27 = sadd.s32 1, %s1178_s16 }
   0x7   : > { %s1407_s22 = smov (%p24_p0, %s23_s22), 0  ;;  %s1409_s23 = smov (!%p24_p0, %s26_s23), %s1194_s20 }
   0x8   : > { %p44_p3 = por %p43_p2, %p42_p1  ;;  %p28_p4 = scmp.ge.s32.totalorder %s1409_s23, 2 }
   0x9   : > { %s31_s24 = ssub.s32 %s1190_s19, %s1407_s22  ;;  %p887_p6 = scmp.ge.s32.totalorder %s1198_s21, 4 }
   0xa   : > { %s1411_s23 = smov (%p28_p4, %s1409_s23), 0 }
   0xb   : > { %s30_s25 = ssub.s32 %s1194_s20, %s1411_s23  ;;  %168 = sbr.rel (%p887_p6) target bundleno = 38 (0x26), region = 24 }
   0xc   : > { %s32_s26 = sor.u32 %s31_s24, %s30_s25 }
   0xd   : > { %p33_p5 = scmp.eq.s32.totalorder %s32_s26, 0 }
   0xf   : > { %s1277_s28 = scalar_select %p33_p5, %s1178_s16, %s35_s27  }
  0x10   : > { %171 = sbr.rel (!%p44_p3) target bundleno = 38 (0x26), region = 28  ;;  %s173_s29 = sand.u32 (%p44_p3), 1, %s1178_s16  }
  0x11   : > { %s998_s30 = sshll.u32 (%p44_p3), %s1194_s20, 5  ;;  %s888_s5 = sshll.u32 (%p44_p3), %s173_s29, 6 }
  0x12   : > { %s178_s6 = sadd.s32 (%p44_p3), %s1190_s19, %s998_s30  ;;  %s175_s11 = scalar_lea.vmem (%p44_p3), [#allocation3], %s888_s5 }
  0x13   : > { %s891_s7 = sshll.u32 (%p44_p3), %s178_s6, 2 }
  0x14   : > { %s1286_s10 = scalar_lea.vmem (%p44_p3), %s1395_s0, %s891_s7 }
  0x15   : > { %v197_v0 = vld [vmem:[%s1286_s10] sm:$0xf]  ;;  %v199_v1 = vld [vmem:[%s1286_s10 + $0x8] sm:$0xf]  ;;  %v201_v2 = vld [vmem:[%s1286_s10 + $0x10] sm:$0xf] }
  0x16   : > { %198 = vst [vmem:[%s175_s11] sm:$0xf] %v197_v0  ;;  %v203_v3 = vld [vmem:[%s1286_s10 + $0x18] sm:$0xf]  ;;  %v205_v4 = vld [vmem:[%s1286_s10 + $0x20] sm:$0xf] }
  0x17   : > { %200 = vst [vmem:[%s175_s11 + $0x4] sm:$0xf] %v199_v1  ;;  %v207_v5 = vld [vmem:[%s1286_s10 + $0x28] sm:$0xf]  ;;  %v209_v6 = vld [vmem:[%s1286_s10 + $0x30] sm:$0xf] }
  0x18   : > { %202 = vst [vmem:[%s175_s11 + $0x8] sm:$0xf] %v201_v2  ;;  %v211_v7 = vld [vmem:[%s1286_s10 + $0x38] sm:$0xf]  ;;  %v213_v8 = vld [vmem:[%s1286_s10 + $0x40] sm:$0xf] }
  0x19   : > { %204 = vst [vmem:[%s175_s11 + $0xc] sm:$0xf] %v203_v3  ;;  %v215_v9 = vld [vmem:[%s1286_s10 + $0x48] sm:$0xf]  ;;  %v217_v10 = vld [vmem:[%s1286_s10 + $0x50] sm:$0xf] }
  0x1a   : > { %206 = vst [vmem:[%s175_s11 + $0x10] sm:$0xf] %v205_v4  ;;  %v219_v11 = vld [vmem:[%s1286_s10 + $0x58] sm:$0xf]  ;;  %v221_v12 = vld [vmem:[%s1286_s10 + $0x60] sm:$0xf] }
  0x1b   : > { %208 = vst [vmem:[%s175_s11 + $0x14] sm:$0xf] %v207_v5  ;;  %v223_v13 = vld [vmem:[%s1286_s10 + $0x68] sm:$0xf]  ;;  %v225_v14 = vld [vmem:[%s1286_s10 + $0x70] sm:$0xf] }
  0x1c   : > { %210 = vst [vmem:[%s175_s11 + $0x18] sm:$0xf] %v209_v6  ;;  %v227_v15 = vld [vmem:[%s1286_s10 + $0x78] sm:$0xf] }
  0x1d   : > { %212 = vst [vmem:[%s175_s11 + $0x1c] sm:$0xf] %v211_v7 }
  0x1e   : > { %214 = vst [vmem:[%s175_s11 + $0x20] sm:$0xf] %v213_v8 }
  0x1f   : > { %216 = vst [vmem:[%s175_s11 + $0x24] sm:$0xf] %v215_v9 }
  0x20   : > { %218 = vst [vmem:[%s175_s11 + $0x28] sm:$0xf] %v217_v10 }
  0x21   : > { %220 = vst [vmem:[%s175_s11 + $0x2c] sm:$0xf] %v219_v11 }
  0x22   : > { %222 = vst [vmem:[%s175_s11 + $0x30] sm:$0xf] %v221_v12 }
  0x23   : > { %224 = vst [vmem:[%s175_s11 + $0x34] sm:$0xf] %v223_v13 }
  0x24   : > { %226 = vst [vmem:[%s175_s11 + $0x38] sm:$0xf] %v225_v14 }
  0x25   : > { %228 = vst [vmem:[%s175_s11 + $0x3c] sm:$0xf] %v227_v15 }
  0x26 PF: > { %p892_p7 = scmp.ge.s32.totalorder %s1198_s21, 1  ;;  %p292_p8 = scmp.lt.s32.totalorder %s1198_s21, 5 }
  0x28   : > { %p293_p9 = pnand %p892_p7, %p292_p8 }
  0x29   : > { %s299_s12 = sand.u32 (!%p293_p9), 1, %s1174_s15   ;;  %s894_s13 = sshll.u32 (!%p293_p9), %s1182_s17, 4 }
  0x2a   : > { %296 = sbr.rel (%p293_p9) target bundleno = 532 (0x214), region = 73  ;;  %s893_s14 = sshll.u32 (!%p293_p9), %s299_s12, 6 }
  0x2b   : > { %p331_p10 = scmp.lt.s32.totalorder (!%p293_p9), %s894_s13, 31  ;;  %s896_s24 = sshll.u32 (!%p293_p9), %s1186_s18, 4 }
  0x2c   : > { %p337_p11 = scmp.lt.s32.totalorder (!%p293_p9), %s896_s24, 31  ;;  %s1319_s15 = scalar_lea.vmem (!%p293_p9), [#allocation3], %s893_s14 }
  0x2d   : > { %p898_p12 = scmp.ne.s32.totalorder (!%p293_p9), %s1182_s17, 0 }
  0x2f   : > { %s1413_s13 = smov (!%p331_p10, %s894_s13), 31  ;;  %s1415_s24 = smov (!%p337_p11, %s896_s24), 31 }
  0x30   : > { %s895_s25 = sshll.u32 %s1413_s13, 2  ;;  %s897_s30 = sshll.u32 %s1415_s24, 2 }
  0x31   : > { %s1312_s29 = scalar_lea.vmem %s1396_s1, %s895_s25  ;;  %s1317_s7 = scalar_lea.vmem %s1399_s4, %s897_s30 }
  0x32   : > { %345 = sbr.rel (%p898_p12) target bundleno = 72 (0x48), region = 81 }
  0x37   : > { %v1200_v16 = vmov 0.0  }
  0x38   : > { %346 = vst [vmem:[#allocation2 + $0x30] sm:$0xff] %v1200_v16 }
  0x39   : > { %347 = vst [vmem:[#allocation2] sm:$0xff] %v1200_v16 }
  0x3a   : > { %348 = vst [vmem:[#allocation2 + $0x58] sm:$0xff] %v1200_v16 }
  0x3b   : > { %349 = vst [vmem:[#allocation2 + $0x18] sm:$0xff] %v1200_v16 }
  0x3c   : > { %350 = vst [vmem:[#allocation2 + $0x50] sm:$0xff] %v1200_v16 }
  0x3d   : > { %351 = vst [vmem:[#allocation2 + $0x68] sm:$0xff] %v1200_v16 }
  0x3e   : > { %352 = vst [vmem:[#allocation2 + $0x8] sm:$0xff] %v1200_v16 }
  0x3f   : > { %353 = vst [vmem:[#allocation2 + $0x48] sm:$0xff] %v1200_v16 }
  0x40   : > { %354 = vst [vmem:[#allocation2 + $0x40] sm:$0xff] %v1200_v16 }
  0x41   : > { %355 = vst [vmem:[#allocation2 + $0x20] sm:$0xff] %v1200_v16 }
  0x42   : > { %356 = vst [vmem:[#allocation2 + $0x10] sm:$0xff] %v1200_v16 }
  0x43   : > { %357 = vst [vmem:[#allocation2 + $0x38] sm:$0xff] %v1200_v16 }
  0x44   : > { %358 = vst [vmem:[#allocation2 + $0x60] sm:$0xff] %v1200_v16 }
  0x45   : > { %359 = vst [vmem:[#allocation2 + $0x70] sm:$0xff] %v1200_v16 }
  0x46   : > { %360 = vst [vmem:[#allocation2 + $0x78] sm:$0xff] %v1200_v16 }
  0x47   : > { %361 = vst [vmem:[#allocation2 + $0x28] sm:$0xff] %v1200_v16 }
  0x48 PF: > { %v1014_v17 = vld [vmem:[%s1397_s2 + $0x38] sm:$0xff]  ;;  %v1013_v18 = vld [vmem:[%s1397_s2 + $0x30] sm:$0xff]  ;;  %v1012_v19 = vld [vmem:[%s1397_s2 + $0x28] sm:$0xff]  ;;  %p995_p13 = scmp.ne.s32.totalorder %s1182_s17, 1 }
  0x49   : > { %1070 = vmatpush.bf16.msra.mxu2 %v1014_v17  ;;  %490 = vmatpush.bf16.msra.mxu0 %v1014_v17  ;;  %v1011_v20 = vld [vmem:[%s1397_s2 + $0x20] sm:$0xff]  ;;  %v1010_v21 = vld [vmem:[%s1397_s2 + $0x18] sm:$0xff]  ;;  %v1009_v22 = vld [vmem:[%s1397_s2 + $0x10] sm:$0xff] }
  0x4a   : > { %v1008_v23 = vld [vmem:[%s1397_s2 + $0x8] sm:$0xff]  ;;  %v1007_v24 = vld [vmem:[%s1397_s2] sm:$0xff]  ;;  %v1005_v29 = vld [vmem:[%s1312_s29 + $0x30] sm:$0xff] }
  0x4b   : > { %v1003_v25 = vld [vmem:[%s1312_s29 + $0x20] sm:$0xff]  ;;  %v1004_v27 = vld [vmem:[%s1312_s29 + $0x28] sm:$0xff]  ;;  %v1001_v30 = vld [vmem:[%s1312_s29 + $0x10] sm:$0xff] }
  0x4c   : > { %v999_v26 = vld [vmem:[%s1312_s29] sm:$0xff]  ;;  %v1000_v28 = vld [vmem:[%s1312_s29 + $0x8] sm:$0xff]  ;;  %v1006_v31 = vld [vmem:[%s1312_s29 + $0x38] sm:$0xff] }
  0x4d   : > { %1071 = vmatpush.bf16.msra.mxu2 %v1013_v18  ;;  %491 = vmatpush.bf16.msra.mxu0 %v1013_v18  ;;  %v1002_v32 = vld [vmem:[%s1312_s29 + $0x18] sm:$0xff]  ;;  %v1015_v57 = vld [vmem:[%s1319_s15] sm:$0xff]  ;;  %v1016_v59 = vld [vmem:[%s1319_s15 + $0x8] sm:$0xff] }
  0x4e   : > { %v1019_v58 = vld [vmem:[%s1319_s15 + $0x20] sm:$0xff]  ;;  %v1020_v60 = vld [vmem:[%s1319_s15 + $0x28] sm:$0xff]  ;;  %v1017_v61 = vld [vmem:[%s1319_s15 + $0x10] sm:$0xff] }
  0x4f   : > { %v1021_v62 = vld [vmem:[%s1319_s15 + $0x30] sm:$0xff]  ;;  %v1018_v63 = vld [vmem:[%s1319_s15 + $0x18] sm:$0xff]  ;;  %v547_v4 = vld [vmem:[#allocation2 + $0x40] sm:$0xff] }
  0x50   : > { %v1022_v0 = vld [vmem:[%s1319_s15 + $0x38] sm:$0xff]  ;;  %v539_v1 = vld [vmem:[#allocation2 + $0x30] sm:$0xff]  ;;  %v540_v6 = vld [vmem:[#allocation2] sm:$0xff] }
  0x51   : > { %1072 = vmatpush.bf16.msra.mxu2 %v1012_v19  ;;  %492 = vmatpush.bf16.msra.mxu0 %v1012_v19  ;;  %v548_v10 = vld [vmem:[#allocation2 + $0x20] sm:$0xff]  ;;  %v541_v12 = vld [vmem:[#allocation2 + $0x58] sm:$0xff]  ;;  %v549_v16 = vld [vmem:[#allocation2 + $0x10] sm:$0xff] }
  0x52   : > { %v542_v18 = vld [vmem:[#allocation2 + $0x18] sm:$0xff] }
  0x55   : > { %1073 = vmatpush.bf16.msra.mxu2 %v1011_v20  ;;  %493 = vmatpush.bf16.msra.mxu0 %v1011_v20 }
  0x59   : > { %1074 = vmatpush.bf16.msra.mxu2 %v1010_v21  ;;  %494 = vmatpush.bf16.msra.mxu0 %v1010_v21 }
  0x5d   : > { %1075 = vmatpush.bf16.msra.mxu2 %v1009_v22  ;;  %495 = vmatpush.bf16.msra.mxu0 %v1009_v22  ;;  %v550_v22 = vld [vmem:[#allocation2 + $0x38] sm:$0xff] }
  0x61   : > { %1076 = vmatpush.bf16.msra.mxu2 %v1008_v23  ;;  %496 = vmatpush.bf16.msra.mxu0 %v1008_v23 }
  0x65   : > { %1077 = vmatpush.bf16.msra.mxu2 %v1007_v24  ;;  %497 = vmatpush.bf16.msra.mxu0 %v1007_v24  ;;  %v543_v24 = vld [vmem:[#allocation2 + $0x50] sm:$0xff] }
  0x68   : > { %518 = vmatmul.bf16.vlgmr.msra.gmra.mxu2 %v1003_v25  ;;  %498 = vmatmul.bf16.vlgmr.msra.gmra.mxu0 %v999_v26 }
  0x78   : > { %523 = vmatmul.bf16.gmra.mxu2 %v1004_v27  ;;  %503 = vmatmul.bf16.gmra.mxu0 %v1000_v28  ;;  %v551_v28 = vld [vmem:[#allocation2 + $0x60] sm:$0xff] }
  0x88   : > { %528 = vmatmul.bf16.gmra.mxu2 %v1005_v29  ;;  %508 = vmatmul.bf16.gmra.mxu0 %v1001_v30  ;;  %v544_v30 = vld [vmem:[#allocation2 + $0x68] sm:$0xff] }
  0x98   : > { %533 = vmatmul.bf16.gmra.mxu2 %v1006_v31  ;;  %513 = vmatmul.bf16.gmra.mxu0 %v1002_v32 }
  0xe5   : > { %v499_v34 = vpop.f32.mrf.mxu0 }
  0xeb   : > { %v519_v33 = vpop.f32.mrf.mxu2 }
  0xed   : > { %v501_v36 = vpop.f32.mrf.mxu0 }
  0xee   : > { %v571_v56 = vpack.c.bf16 %v501_v36, %v499_v34  ;;  %v552_v34 = vld [vmem:[#allocation2 + $0x70] sm:$0xff]  ;;  %v545_v36 = vld [vmem:[#allocation2 + $0x8] sm:$0xff] }
  0xf3   : > { %v521_v35 = vpop.f32.mrf.mxu2 }
  0xf4   : > { %v575_v51 = vpack.c.bf16 %v521_v35, %v519_v33 }
  0xf5   : > { %v504_v38 = vpop.f32.mrf.mxu0 }
  0xfb   : > { %v524_v37 = vpop.f32.mrf.mxu2 }
  0xfd   : > { %v506_v40 = vpop.f32.mrf.mxu0 }
  0xfe   : > { %v572_v55 = vpack.c.bf16 %v506_v40, %v504_v38  ;;  %v553_v40 = vld [vmem:[#allocation2 + $0x78] sm:$0xff] }
 0x103   : > { %v526_v39 = vpop.f32.mrf.mxu2 }
 0x104   : > { %v576_v50 = vpack.c.bf16 %v526_v39, %v524_v37 }
 0x105   : > { %v509_v42 = vpop.f32.mrf.mxu0 }
 0x10b   : > { %v529_v41 = vpop.f32.mrf.mxu2 }
 0x10d   : > { %v511_v45 = vpop.f32.mrf.mxu0 }
 0x10e   : > { %v573_v54 = vpack.c.bf16 %v511_v45, %v509_v42  ;;  %v546_v42 = vld [vmem:[#allocation2 + $0x48] sm:$0xff] }
 0x113   : > { %v531_v43 = vpop.f32.mrf.mxu2 }
 0x114   : > { %v577_v49 = vpack.c.bf16 %v531_v43, %v529_v41 }
 0x115   : > { %v514_v48 = vpop.f32.mrf.mxu0 }
 0x11b   : > { %v534_v44 = vpop.f32.mrf.mxu2 }
 0x11d   : > { %v516_v52 = vpop.f32.mrf.mxu0 }
 0x11e   : > { %v574_v53 = vpack.c.bf16 %v516_v52, %v514_v48 }
 0x123   : > { %v536_v46 = vpop.f32.mrf.mxu2 }
 0x124   : > { %v578_v47 = vpack.c.bf16 %v536_v46, %v534_v44  ;;  %v554_v46 = vld [vmem:[#allocation2 + $0x28] sm:$0xff] }
 0x126   : > { %627 = vmatpush.bf16.msra.mxu1 %v578_v47  ;;  %1078 = vmatpush.bf16.msra.mxu3 %v578_v47 }
 0x12a   : > { %628 = vmatpush.bf16.msra.mxu1 %v577_v49  ;;  %1079 = vmatpush.bf16.msra.mxu3 %v577_v49 }
 0x12e   : > { %629 = vmatpush.bf16.msra.mxu1 %v576_v50  ;;  %1080 = vmatpush.bf16.msra.mxu3 %v576_v50 }
 0x132   : > { %630 = vmatpush.bf16.msra.mxu1 %v575_v51  ;;  %1081 = vmatpush.bf16.msra.mxu3 %v575_v51 }
 0x136   : > { %631 = vmatpush.bf16.msra.mxu1 %v574_v53  ;;  %1082 = vmatpush.bf16.msra.mxu3 %v574_v53 }
 0x13a   : > { %632 = vmatpush.bf16.msra.mxu1 %v573_v54  ;;  %1083 = vmatpush.bf16.msra.mxu3 %v573_v54 }
 0x13e   : > { %633 = vmatpush.bf16.msra.mxu1 %v572_v55  ;;  %1084 = vmatpush.bf16.msra.mxu3 %v572_v55 }
 0x142   : > { %634 = vmatpush.bf16.msra.mxu1 %v571_v56  ;;  %1085 = vmatpush.bf16.msra.mxu3 %v571_v56 }
 0x145   : > { %635 = vmatmul.bf16.vlgmr.msra.gmra.mxu1 %v1015_v57  ;;  %655 = vmatmul.bf16.vlgmr.msra.gmra.mxu3 %v1019_v58 }
 0x155   : > { %640 = vmatmul.bf16.gmra.mxu1 %v1016_v59  ;;  %660 = vmatmul.bf16.gmra.mxu3 %v1020_v60 }
 0x165   : > { %645 = vmatmul.bf16.gmra.mxu1 %v1017_v61  ;;  %665 = vmatmul.bf16.gmra.mxu3 %v1021_v62 }
 0x175   : > { %650 = vmatmul.bf16.gmra.mxu1 %v1018_v63  ;;  %670 = vmatmul.bf16.gmra.mxu3 %v1022_v0 }
 0x1c2   : > { %v636_v2 = vpop.f32.mrf.mxu1 }
 0x1c3   : > { %v676_v3 = vadd.f32 %v636_v2, %v539_v1 }
 0x1c5   : > { %692 = vst [vmem:[#allocation2 + $0x30] sm:$0xff] %v676_v3 }
 0x1c8   : > { %v656_v5 = vpop.f32.mrf.mxu3 }
 0x1c9   : > { %v684_v7 = vadd.f32 %v656_v5, %v547_v4 }
 0x1ca   : > { %v638_v8 = vpop.f32.mrf.mxu1 }
 0x1cb   : > { %700 = vst [vmem:[#allocation2 + $0x40] sm:$0xff] %v684_v7  ;;  %v677_v9 = vadd.f32 %v638_v8, %v540_v6 }
 0x1cd   : > { %693 = vst [vmem:[#allocation2] sm:$0xff] %v677_v9 }
 0x1d0   : > { %v658_v11 = vpop.f32.mrf.mxu3 }
 0x1d1   : > { %v685_v13 = vadd.f32 %v658_v11, %v548_v10 }
 0x1d2   : > { %v641_v14 = vpop.f32.mrf.mxu1 }
 0x1d3   : > { %701 = vst [vmem:[#allocation2 + $0x20] sm:$0xff] %v685_v13  ;;  %v678_v15 = vadd.f32 %v641_v14, %v541_v12 }
 0x1d5   : > { %694 = vst [vmem:[#allocation2 + $0x58] sm:$0xff] %v678_v15 }
 0x1d8   : > { %v661_v17 = vpop.f32.mrf.mxu3 }
 0x1d9   : > { %v686_v19 = vadd.f32 %v661_v17, %v549_v16 }
 0x1da   : > { %v643_v20 = vpop.f32.mrf.mxu1 }
 0x1db   : > { %702 = vst [vmem:[#allocation2 + $0x10] sm:$0xff] %v686_v19  ;;  %v679_v21 = vadd.f32 %v643_v20, %v542_v18 }
 0x1dd   : > { %695 = vst [vmem:[#allocation2 + $0x18] sm:$0xff] %v679_v21 }
 0x1e0   : > { %v663_v23 = vpop.f32.mrf.mxu3 }
 0x1e1   : > { %v687_v25 = vadd.f32 %v663_v23, %v550_v22 }
 0x1e2   : > { %v646_v26 = vpop.f32.mrf.mxu1 }
 0x1e3   : > { %703 = vst [vmem:[#allocation2 + $0x38] sm:$0xff] %v687_v25  ;;  %v680_v27 = vadd.f32 %v646_v26, %v543_v24 }
 0x1e5   : > { %696 = vst [vmem:[#allocation2 + $0x50] sm:$0xff] %v680_v27 }
 0x1e8   : > { %v666_v29 = vpop.f32.mrf.mxu3 }
 0x1e9   : > { %v688_v31 = vadd.f32 %v666_v29, %v551_v28 }
 0x1ea   : > { %v648_v32 = vpop.f32.mrf.mxu1 }
 0x1eb   : > { %704 = vst [vmem:[#allocation2 + $0x60] sm:$0xff] %v688_v31  ;;  %v681_v33 = vadd.f32 %v648_v32, %v544_v30 }
 0x1ed   : > { %697 = vst [vmem:[#allocation2 + $0x68] sm:$0xff] %v681_v33 }
 0x1f0   : > { %v668_v35 = vpop.f32.mrf.mxu3 }
 0x1f1   : > { %v689_v37 = vadd.f32 %v668_v35, %v552_v34 }
 0x1f2   : > { %v651_v38 = vpop.f32.mrf.mxu1 }
 0x1f3   : > { %705 = vst [vmem:[#allocation2 + $0x70] sm:$0xff] %v689_v37  ;;  %v682_v39 = vadd.f32 %v651_v38, %v545_v36 }
 0x1f5   : > { %698 = vst [vmem:[#allocation2 + $0x8] sm:$0xff] %v682_v39 }
 0x1f8   : > { %v671_v41 = vpop.f32.mrf.mxu3 }
 0x1f9   : > { %v690_v43 = vadd.f32 %v671_v41, %v553_v40 }
 0x1fa   : > { %v653_v44 = vpop.f32.mrf.mxu1 }
 0x1fb   : > { %706 = vst [vmem:[#allocation2 + $0x78] sm:$0xff] %v690_v43  ;;  %v683_v45 = vadd.f32 %v653_v44, %v546_v42 }
 0x1fd   : > { %699 = vst [vmem:[#allocation2 + $0x48] sm:$0xff] %v683_v45 }
 0x1ff   : > { %711 = sbr.rel (%p995_p13) target bundleno = 532 (0x214), region = 85 }
 0x200   : > { %v673_v47 = vpop.f32.mrf.mxu3 }
 0x201   : > { %v691_v48 = vadd.f32 %v673_v47, %v554_v46 }
 0x203   : > { %707 = vst [vmem:[#allocation2 + $0x28] sm:$0xff] %v691_v48 }
 0x204   : > { %v712_v49 = vld [vmem:[#allocation2 + $0x30] sm:$0xff]  ;;  %v713_v50 = vld [vmem:[#allocation2] sm:$0xff]  ;;  %v714_v52 = vld [vmem:[#allocation2 + $0x58] sm:$0xff] }
 0x205   : > { %v1143_v51 = vld [vmem:[%s1398_s3] ss:$0 sm:$0xff]  ;;  %v715_v53 = vld [vmem:[#allocation2 + $0x18] sm:$0xff]  ;;  %v716_v54 = vld [vmem:[#allocation2 + $0x50] sm:$0xff] }
 0x206   : > { %v717_v55 = vld [vmem:[#allocation2 + $0x68] sm:$0xff]  ;;  %v732_v57 = vadd.f32 %v1143_v51, %v712_v49  ;;  %v733_v58 = vadd.f32 %v1143_v51, %v713_v50  ;;  %v734_v59 = vadd.f32 %v1143_v51, %v714_v52  ;;  %v735_v60 = vadd.f32 %v1143_v51, %v715_v53  ;;  %v720_v2 = vld [vmem:[#allocation2 + $0x40] sm:$0xff]  ;;  %v722_v8 = vld [vmem:[#allocation2 + $0x10] sm:$0xff] }
 0x207   : > { %v718_v56 = vld [vmem:[#allocation2 + $0x8] sm:$0xff]  ;;  %v736_v62 = vadd.f32 %v1143_v51, %v716_v54  ;;  %v737_v63 = vadd.f32 %v1143_v51, %v717_v55  ;;  %v721_v3 = vld [vmem:[#allocation2 + $0x20] sm:$0xff]  ;;  %v723_v9 = vld [vmem:[#allocation2 + $0x38] sm:$0xff]  ;;  %v740_v18 = vadd.f32 %v1143_v51, %v720_v2  ;;  %v742_v24 = vadd.f32 %v1143_v51, %v722_v8 }
 0x208   : > { %v719_v61 = vld [vmem:[#allocation2 + $0x48] sm:$0xff]  ;;  %v738_v0 = vadd.f32 %v1143_v51, %v718_v56  ;;  %v748_v4 = vmax.f32 %v732_v57, 0.0  ;;  %v749_v5 = vmax.f32 %v733_v58, 0.0  ;;  %v750_v6 = vmax.f32 %v734_v59, 0.0  ;;  %v724_v14 = vld [vmem:[#allocation2 + $0x60] sm:$0xff]  ;;  %v725_v15 = vld [vmem:[#allocation2 + $0x70] sm:$0xff] }
 0x209   : > { %v739_v1 = vadd.f32 %v1143_v51, %v719_v61  ;;  %v751_v7 = vmax.f32 %v735_v60, 0.0  ;;  %v752_v10 = vmax.f32 %v736_v62, 0.0  ;;  %v753_v11 = vmax.f32 %v737_v63, 0.0  ;;  %v726_v20 = vld [vmem:[#allocation2 + $0x78] sm:$0xff] }
 0x20a   : > { %v754_v12 = vmax.f32 %v738_v0, 0.0  ;;  %v1026_v16 = vpack.c.bf16 %v749_v5, %v748_v4  ;;  %v741_v19 = vadd.f32 %v1143_v51, %v721_v3  ;;  %v727_v21 = vld [vmem:[#allocation2 + $0x28] sm:$0xff]  ;;  %v743_v25 = vadd.f32 %v1143_v51, %v723_v9 }
 0x20b   : > { %v755_v13 = vmax.f32 %v739_v1, 0.0  ;;  %v1031_v17 = vpack.c.bf16 %v751_v7, %v750_v6  ;;  %v1036_v22 = vpack.c.bf16 %v753_v11, %v752_v10  ;;  %v756_v26 = vmax.f32 %v740_v18, 0.0 }
 0x20c   : > { %1027 = vst [vmem:[%s1317_s7] sm:$0xff] %v1026_v16   ;;  %v757_v27 = vmax.f32 %v741_v19, 0.0  ;;  %v744_v28 = vadd.f32 %v1143_v51, %v724_v14  ;;  %v745_v29 = vadd.f32 %v1143_v51, %v725_v15  ;;  %v758_v30 = vmax.f32 %v742_v24, 0.0 }
 0x20d   : > { %v1041_v23 = vpack.c.bf16 %v755_v13, %v754_v12  ;;  %1063 = vst [vmem:[%s1317_s7 + $0x8] sm:$0xff] %v1031_v17   ;;  %v759_v31 = vmax.f32 %v743_v25, 0.0  ;;  %v746_v32 = vadd.f32 %v1143_v51, %v726_v20  ;;  %v747_v33 = vadd.f32 %v1143_v51, %v727_v21 }
 0x20e   : > { %1064 = vst [vmem:[%s1317_s7 + $0x10] sm:$0xff] %v1036_v22   ;;  %v1046_v34 = vpack.c.bf16 %v757_v27, %v756_v26  ;;  %v760_v35 = vmax.f32 %v744_v28, 0.0  ;;  %v761_v36 = vmax.f32 %v745_v29, 0.0 }
 0x20f   : > { %1065 = vst [vmem:[%s1317_s7 + $0x18] sm:$0xff] %v1041_v23   ;;  %v1051_v37 = vpack.c.bf16 %v759_v31, %v758_v30  ;;  %v762_v38 = vmax.f32 %v746_v32, 0.0  ;;  %v763_v39 = vmax.f32 %v747_v33, 0.0 }
 0x210   : > { %1066 = vst [vmem:[%s1317_s7 + $0x20] sm:$0xff] %v1046_v34   ;;  %v1056_v40 = vpack.c.bf16 %v761_v36, %v760_v35 }
 0x211   : > { %1067 = vst [vmem:[%s1317_s7 + $0x28] sm:$0xff] %v1051_v37   ;;  %v1061_v41 = vpack.c.bf16 %v763_v39, %v762_v38 }
 0x212   : > { %1068 = vst [vmem:[%s1317_s7 + $0x30] sm:$0xff] %v1056_v40  }
 0x213   : > { %1069 = vst [vmem:[%s1317_s7 + $0x38] sm:$0xff] %v1061_v41  }
 0x214 PF: > { %s14_s21 = sadd.s32 1, %s1198_s21   ;;  %s1400_s15 = smov %s1178_s16 }
 0x215   : > { %p11_p0 = scmp.ge.s32.totalorder %s14_s21, 6   ;;  %s1401_s16 = smov %s1277_s28 }
 0x216   : > { %s1402_s17 = smov %s1190_s19  ;;  %s1403_s18 = smov %s1194_s20 }
 0x217   : > { %s1404_s19 = smov %s1407_s22  ;;  %s1405_s20 = smov %s1411_s23 }
 0x218   :  { %13 = sbr.rel (!%p11_p0) target bundleno = 4 (0x4), region = 123 }

// kernel: gnn_forward.3
= control target key start
LH: loop header
LB: loop body
LE: loop exit
PB: predicated region body
PF: predicated region fallthrough
CT: control target
= control target key end

     0   :  { %s1147_s15 = smov 0   ;;  %s1149_s16 = smov 0   ;;  %s1324_s0 = inlined_call_operand.vmem [shape: bf16[256,256], index: 0, kind: input, shape index: {}]   ;;  %s1325_s1 = inlined_call_operand.vmem [shape: bf16[256,128], index: 1, kind: input, shape index: {}]   ;;  %s1326_s2 = inlined_call_operand.vmem [shape: bf16[128,128], index: 2, kind: input, shape index: {}]   ;;  %s1327_s3 = inlined_call_operand.vmem [shape: f32[1,128], index: 3, kind: input, shape index: {}]   ;;  %s1328_s4 = inlined_call_operand.vmem [shape: f32[256,128], index: 4, kind: output, shape index: {}]  }
   0x1   :  { %s1151_s17 = smov 0   ;;  %s1153_s18 = smov 0  }
   0x2   :  { %s1155_s19 = smov 0   ;;  %s1157_s20 = smov 0  }
   0x3   :  { %s1159_s21 = smov 0  }
   0x4 LB: > { %s23_s22 = sadd.s32 1, %s1111_s19  ;;  %s26_s23 = sadd.s32 1, %s1115_s20  ;;  %s1119_s21 = sphi %s1159_s21, %s14_s21   ;;  %s1115_s20 = sphi %s1157_s20, %s1334_s20   ;;  %s1111_s19 = sphi %s1155_s19, %s1333_s19   ;;  %s1107_s18 = sphi %s1153_s18, %s1332_s18   ;;  %s1103_s17 = sphi %s1151_s17, %s1331_s17   ;;  %s1099_s16 = sphi %s1149_s16, %s1330_s16   ;;  %s1095_s15 = sphi %s1147_s15, %s1329_s15  }
   0x5   : > { %p24_p0 = scmp.ge.s32.totalorder %s23_s22, 2  ;;  %p42_p1 = scmp.ne.s32.totalorder %s1099_s16, %s1095_s15 }
   0x6   : > { %p43_p2 = scmp.eq.s32.totalorder %s1119_s21, 0  ;;  %s35_s27 = sadd.s32 1, %s1099_s16 }
   0x7   : > { %s1336_s22 = smov (%p24_p0, %s23_s22), 0  ;;  %s1338_s23 = smov (!%p24_p0, %s26_s23), %s1115_s20 }
   0x8   : > { %p44_p3 = por %p43_p2, %p42_p1  ;;  %p28_p4 = scmp.ge.s32.totalorder %s1338_s23, 2 }
   0x9   : > { %s31_s24 = ssub.s32 %s1111_s19, %s1336_s22  ;;  %p855_p6 = scmp.ge.s32.totalorder %s1119_s21, 4 }
   0xa   : > { %s1340_s23 = smov (%p28_p4, %s1338_s23), 0 }
   0xb   : > { %s30_s25 = ssub.s32 %s1115_s20, %s1340_s23  ;;  %168 = sbr.rel (%p855_p6) target bundleno = 38 (0x26), region = 24 }
   0xc   : > { %s32_s26 = sor.u32 %s31_s24, %s30_s25 }
   0xd   : > { %p33_p5 = scmp.eq.s32.totalorder %s32_s26, 0 }
   0xf   : > { %s1198_s28 = scalar_select %p33_p5, %s1099_s16, %s35_s27  }
  0x10   : > { %171 = sbr.rel (!%p44_p3) target bundleno = 38 (0x26), region = 28  ;;  %s173_s29 = sand.u32 (%p44_p3), 1, %s1099_s16  }
  0x11   : > { %s966_s30 = sshll.u32 (%p44_p3), %s1115_s20, 5  ;;  %s856_s5 = sshll.u32 (%p44_p3), %s173_s29, 6 }
  0x12   : > { %s178_s6 = sadd.s32 (%p44_p3), %s1111_s19, %s966_s30  ;;  %s175_s11 = scalar_lea.vmem (%p44_p3), [#allocation3], %s856_s5 }
  0x13   : > { %s859_s7 = sshll.u32 (%p44_p3), %s178_s6, 2 }
  0x14   : > { %s1207_s10 = scalar_lea.vmem (%p44_p3), %s1324_s0, %s859_s7 }
  0x15   : > { %v197_v0 = vld [vmem:[%s1207_s10] sm:$0xf]  ;;  %v199_v1 = vld [vmem:[%s1207_s10 + $0x8] sm:$0xf]  ;;  %v201_v2 = vld [vmem:[%s1207_s10 + $0x10] sm:$0xf] }
  0x16   : > { %198 = vst [vmem:[%s175_s11] sm:$0xf] %v197_v0  ;;  %v203_v3 = vld [vmem:[%s1207_s10 + $0x18] sm:$0xf]  ;;  %v205_v4 = vld [vmem:[%s1207_s10 + $0x20] sm:$0xf] }
  0x17   : > { %200 = vst [vmem:[%s175_s11 + $0x4] sm:$0xf] %v199_v1  ;;  %v207_v5 = vld [vmem:[%s1207_s10 + $0x28] sm:$0xf]  ;;  %v209_v6 = vld [vmem:[%s1207_s10 + $0x30] sm:$0xf] }
  0x18   : > { %202 = vst [vmem:[%s175_s11 + $0x8] sm:$0xf] %v201_v2  ;;  %v211_v7 = vld [vmem:[%s1207_s10 + $0x38] sm:$0xf]  ;;  %v213_v8 = vld [vmem:[%s1207_s10 + $0x40] sm:$0xf] }
  0x19   : > { %204 = vst [vmem:[%s175_s11 + $0xc] sm:$0xf] %v203_v3  ;;  %v215_v9 = vld [vmem:[%s1207_s10 + $0x48] sm:$0xf]  ;;  %v217_v10 = vld [vmem:[%s1207_s10 + $0x50] sm:$0xf] }
  0x1a   : > { %206 = vst [vmem:[%s175_s11 + $0x10] sm:$0xf] %v205_v4  ;;  %v219_v11 = vld [vmem:[%s1207_s10 + $0x58] sm:$0xf]  ;;  %v221_v12 = vld [vmem:[%s1207_s10 + $0x60] sm:$0xf] }
  0x1b   : > { %208 = vst [vmem:[%s175_s11 + $0x14] sm:$0xf] %v207_v5  ;;  %v223_v13 = vld [vmem:[%s1207_s10 + $0x68] sm:$0xf]  ;;  %v225_v14 = vld [vmem:[%s1207_s10 + $0x70] sm:$0xf] }
  0x1c   : > { %210 = vst [vmem:[%s175_s11 + $0x18] sm:$0xf] %v209_v6  ;;  %v227_v15 = vld [vmem:[%s1207_s10 + $0x78] sm:$0xf] }
  0x1d   : > { %212 = vst [vmem:[%s175_s11 + $0x1c] sm:$0xf] %v211_v7 }
  0x1e   : > { %214 = vst [vmem:[%s175_s11 + $0x20] sm:$0xf] %v213_v8 }
  0x1f   : > { %216 = vst [vmem:[%s175_s11 + $0x24] sm:$0xf] %v215_v9 }
  0x20   : > { %218 = vst [vmem:[%s175_s11 + $0x28] sm:$0xf] %v217_v10 }
  0x21   : > { %220 = vst [vmem:[%s175_s11 + $0x2c] sm:$0xf] %v219_v11 }
  0x22   : > { %222 = vst [vmem:[%s175_s11 + $0x30] sm:$0xf] %v221_v12 }
  0x23   : > { %224 = vst [vmem:[%s175_s11 + $0x34] sm:$0xf] %v223_v13 }
  0x24   : > { %226 = vst [vmem:[%s175_s11 + $0x38] sm:$0xf] %v225_v14 }
  0x25   : > { %228 = vst [vmem:[%s175_s11 + $0x3c] sm:$0xf] %v227_v15 }
  0x26 PF: > { %p860_p7 = scmp.ge.s32.totalorder %s1119_s21, 1  ;;  %p292_p8 = scmp.lt.s32.totalorder %s1119_s21, 5 }
  0x28   : > { %p293_p9 = pnand %p860_p7, %p292_p8 }
  0x29   : > { %s299_s12 = sand.u32 (!%p293_p9), 1, %s1095_s15   ;;  %s862_s13 = sshll.u32 (!%p293_p9), %s1103_s17, 4 }
  0x2a   : > { %296 = sbr.rel (%p293_p9) target bundleno = 535 (0x217), region = 73  ;;  %s861_s14 = sshll.u32 (!%p293_p9), %s299_s12, 6 }
  0x2b   : > { %p331_p10 = scmp.lt.s32.totalorder (!%p293_p9), %s862_s13, 31  ;;  %s864_s24 = sshll.u32 (!%p293_p9), %s1107_s18, 4 }
  0x2c   : > { %p337_p11 = scmp.lt.s32.totalorder (!%p293_p9), %s864_s24, 31  ;;  %s1240_s15 = scalar_lea.vmem (!%p293_p9), [#allocation3], %s861_s14 }
  0x2d   : > { %p866_p12 = scmp.ne.s32.totalorder (!%p293_p9), %s1103_s17, 0 }
  0x2f   : > { %s1342_s13 = smov (!%p331_p10, %s862_s13), 31  ;;  %s1344_s24 = smov (!%p337_p11, %s864_s24), 31 }
  0x30   : > { %s863_s25 = sshll.u32 %s1342_s13, 2  ;;  %s865_s30 = sshll.u32 %s1344_s24, 3 }
  0x31   : > { %s1233_s29 = scalar_lea.vmem %s1325_s1, %s863_s25  ;;  %s1238_s7 = scalar_lea.vmem %s1328_s4, %s865_s30 }
  0x32   : > { %345 = sbr.rel (%p866_p12) target bundleno = 72 (0x48), region = 81 }
  0x37   : > { %v1121_v16 = vmov 0.0  }
  0x38   : > { %346 = vst [vmem:[#allocation2 + $0x30] sm:$0xff] %v1121_v16 }
  0x39   : > { %347 = vst [vmem:[#allocation2] sm:$0xff] %v1121_v16 }
  0x3a   : > { %348 = vst [vmem:[#allocation2 + $0x58] sm:$0xff] %v1121_v16 }
  0x3b   : > { %349 = vst [vmem:[#allocation2 + $0x18] sm:$0xff] %v1121_v16 }
  0x3c   : > { %350 = vst [vmem:[#allocation2 + $0x50] sm:$0xff] %v1121_v16 }
  0x3d   : > { %351 = vst [vmem:[#allocation2 + $0x68] sm:$0xff] %v1121_v16 }
  0x3e   : > { %352 = vst [vmem:[#allocation2 + $0x8] sm:$0xff] %v1121_v16 }
  0x3f   : > { %353 = vst [vmem:[#allocation2 + $0x48] sm:$0xff] %v1121_v16 }
  0x40   : > { %354 = vst [vmem:[#allocation2 + $0x40] sm:$0xff] %v1121_v16 }
  0x41   : > { %355 = vst [vmem:[#allocation2 + $0x20] sm:$0xff] %v1121_v16 }
  0x42   : > { %356 = vst [vmem:[#allocation2 + $0x10] sm:$0xff] %v1121_v16 }
  0x43   : > { %357 = vst [vmem:[#allocation2 + $0x38] sm:$0xff] %v1121_v16 }
  0x44   : > { %358 = vst [vmem:[#allocation2 + $0x60] sm:$0xff] %v1121_v16 }
  0x45   : > { %359 = vst [vmem:[#allocation2 + $0x70] sm:$0xff] %v1121_v16 }
  0x46   : > { %360 = vst [vmem:[#allocation2 + $0x78] sm:$0xff] %v1121_v16 }
  0x47   : > { %361 = vst [vmem:[#allocation2 + $0x28] sm:$0xff] %v1121_v16 }
  0x48 PF: > { %v982_v17 = vld [vmem:[%s1326_s2 + $0x38] sm:$0xff]  ;;  %v981_v18 = vld [vmem:[%s1326_s2 + $0x30] sm:$0xff]  ;;  %v980_v19 = vld [vmem:[%s1326_s2 + $0x28] sm:$0xff]  ;;  %p963_p13 = scmp.ne.s32.totalorder %s1103_s17, 1 }
  0x49   : > { %991 = vmatpush.bf16.msra.mxu2 %v982_v17  ;;  %490 = vmatpush.bf16.msra.mxu0 %v982_v17  ;;  %v979_v20 = vld [vmem:[%s1326_s2 + $0x20] sm:$0xff]  ;;  %v978_v21 = vld [vmem:[%s1326_s2 + $0x18] sm:$0xff]  ;;  %v977_v22 = vld [vmem:[%s1326_s2 + $0x10] sm:$0xff] }
  0x4a   : > { %v976_v23 = vld [vmem:[%s1326_s2 + $0x8] sm:$0xff]  ;;  %v975_v24 = vld [vmem:[%s1326_s2] sm:$0xff]  ;;  %v973_v29 = vld [vmem:[%s1233_s29 + $0x30] sm:$0xff] }
  0x4b   : > { %v971_v25 = vld [vmem:[%s1233_s29 + $0x20] sm:$0xff]  ;;  %v972_v27 = vld [vmem:[%s1233_s29 + $0x28] sm:$0xff]  ;;  %v969_v30 = vld [vmem:[%s1233_s29 + $0x10] sm:$0xff] }
  0x4c   : > { %v967_v26 = vld [vmem:[%s1233_s29] sm:$0xff]  ;;  %v968_v28 = vld [vmem:[%s1233_s29 + $0x8] sm:$0xff]  ;;  %v974_v31 = vld [vmem:[%s1233_s29 + $0x38] sm:$0xff] }
  0x4d   : > { %992 = vmatpush.bf16.msra.mxu2 %v981_v18  ;;  %491 = vmatpush.bf16.msra.mxu0 %v981_v18  ;;  %v970_v32 = vld [vmem:[%s1233_s29 + $0x18] sm:$0xff]  ;;  %v983_v57 = vld [vmem:[%s1240_s15] sm:$0xff]  ;;  %v984_v59 = vld [vmem:[%s1240_s15 + $0x8] sm:$0xff] }
  0x4e   : > { %v987_v58 = vld [vmem:[%s1240_s15 + $0x20] sm:$0xff]  ;;  %v988_v60 = vld [vmem:[%s1240_s15 + $0x28] sm:$0xff]  ;;  %v985_v61 = vld [vmem:[%s1240_s15 + $0x10] sm:$0xff] }
  0x4f   : > { %v989_v62 = vld [vmem:[%s1240_s15 + $0x30] sm:$0xff]  ;;  %v986_v63 = vld [vmem:[%s1240_s15 + $0x18] sm:$0xff]  ;;  %v547_v4 = vld [vmem:[#allocation2 + $0x40] sm:$0xff] }
  0x50   : > { %v990_v0 = vld [vmem:[%s1240_s15 + $0x38] sm:$0xff]  ;;  %v539_v1 = vld [vmem:[#allocation2 + $0x30] sm:$0xff]  ;;  %v540_v6 = vld [vmem:[#allocation2] sm:$0xff] }
  0x51   : > { %993 = vmatpush.bf16.msra.mxu2 %v980_v19  ;;  %492 = vmatpush.bf16.msra.mxu0 %v980_v19  ;;  %v548_v10 = vld [vmem:[#allocation2 + $0x20] sm:$0xff]  ;;  %v541_v12 = vld [vmem:[#allocation2 + $0x58] sm:$0xff]  ;;  %v549_v16 = vld [vmem:[#allocation2 + $0x10] sm:$0xff] }
  0x52   : > { %v542_v18 = vld [vmem:[#allocation2 + $0x18] sm:$0xff] }
  0x55   : > { %994 = vmatpush.bf16.msra.mxu2 %v979_v20  ;;  %493 = vmatpush.bf16.msra.mxu0 %v979_v20 }
  0x59   : > { %995 = vmatpush.bf16.msra.mxu2 %v978_v21  ;;  %494 = vmatpush.bf16.msra.mxu0 %v978_v21 }
  0x5d   : > { %996 = vmatpush.bf16.msra.mxu2 %v977_v22  ;;  %495 = vmatpush.bf16.msra.mxu0 %v977_v22  ;;  %v550_v22 = vld [vmem:[#allocation2 + $0x38] sm:$0xff] }
  0x61   : > { %997 = vmatpush.bf16.msra.mxu2 %v976_v23  ;;  %496 = vmatpush.bf16.msra.mxu0 %v976_v23 }
  0x65   : > { %998 = vmatpush.bf16.msra.mxu2 %v975_v24  ;;  %497 = vmatpush.bf16.msra.mxu0 %v975_v24  ;;  %v543_v24 = vld [vmem:[#allocation2 + $0x50] sm:$0xff] }
  0x68   : > { %518 = vmatmul.bf16.vlgmr.msra.gmra.mxu2 %v971_v25  ;;  %498 = vmatmul.bf16.vlgmr.msra.gmra.mxu0 %v967_v26 }
  0x78   : > { %523 = vmatmul.bf16.gmra.mxu2 %v972_v27  ;;  %503 = vmatmul.bf16.gmra.mxu0 %v968_v28  ;;  %v551_v28 = vld [vmem:[#allocation2 + $0x60] sm:$0xff] }
  0x88   : > { %528 = vmatmul.bf16.gmra.mxu2 %v973_v29  ;;  %508 = vmatmul.bf16.gmra.mxu0 %v969_v30  ;;  %v544_v30 = vld [vmem:[#allocation2 + $0x68] sm:$0xff] }
  0x98   : > { %533 = vmatmul.bf16.gmra.mxu2 %v974_v31  ;;  %513 = vmatmul.bf16.gmra.mxu0 %v970_v32 }
  0xe5   : > { %v499_v34 = vpop.f32.mrf.mxu0 }
  0xeb   : > { %v519_v33 = vpop.f32.mrf.mxu2 }
  0xed   : > { %v501_v36 = vpop.f32.mrf.mxu0 }
  0xee   : > { %v571_v56 = vpack.c.bf16 %v501_v36, %v499_v34  ;;  %v552_v34 = vld [vmem:[#allocation2 + $0x70] sm:$0xff]  ;;  %v545_v36 = vld [vmem:[#allocation2 + $0x8] sm:$0xff] }
  0xf3   : > { %v521_v35 = vpop.f32.mrf.mxu2 }
  0xf4   : > { %v575_v51 = vpack.c.bf16 %v521_v35, %v519_v33 }
  0xf5   : > { %v504_v38 = vpop.f32.mrf.mxu0 }
  0xfb   : > { %v524_v37 = vpop.f32.mrf.mxu2 }
  0xfd   : > { %v506_v40 = vpop.f32.mrf.mxu0 }
  0xfe   : > { %v572_v55 = vpack.c.bf16 %v506_v40, %v504_v38  ;;  %v553_v40 = vld [vmem:[#allocation2 + $0x78] sm:$0xff] }
 0x103   : > { %v526_v39 = vpop.f32.mrf.mxu2 }
 0x104   : > { %v576_v50 = vpack.c.bf16 %v526_v39, %v524_v37 }
 0x105   : > { %v509_v42 = vpop.f32.mrf.mxu0 }
 0x10b   : > { %v529_v41 = vpop.f32.mrf.mxu2 }
 0x10d   : > { %v511_v45 = vpop.f32.mrf.mxu0 }
 0x10e   : > { %v573_v54 = vpack.c.bf16 %v511_v45, %v509_v42  ;;  %v546_v42 = vld [vmem:[#allocation2 + $0x48] sm:$0xff] }
 0x113   : > { %v531_v43 = vpop.f32.mrf.mxu2 }
 0x114   : > { %v577_v49 = vpack.c.bf16 %v531_v43, %v529_v41 }
 0x115   : > { %v514_v48 = vpop.f32.mrf.mxu0 }
 0x11b   : > { %v534_v44 = vpop.f32.mrf.mxu2 }
 0x11d   : > { %v516_v52 = vpop.f32.mrf.mxu0 }
 0x11e   : > { %v574_v53 = vpack.c.bf16 %v516_v52, %v514_v48 }
 0x123   : > { %v536_v46 = vpop.f32.mrf.mxu2 }
 0x124   : > { %v578_v47 = vpack.c.bf16 %v536_v46, %v534_v44  ;;  %v554_v46 = vld [vmem:[#allocation2 + $0x28] sm:$0xff] }
 0x126   : > { %627 = vmatpush.bf16.msra.mxu1 %v578_v47  ;;  %999 = vmatpush.bf16.msra.mxu3 %v578_v47 }
 0x12a   : > { %628 = vmatpush.bf16.msra.mxu1 %v577_v49  ;;  %1000 = vmatpush.bf16.msra.mxu3 %v577_v49 }
 0x12e   : > { %629 = vmatpush.bf16.msra.mxu1 %v576_v50  ;;  %1001 = vmatpush.bf16.msra.mxu3 %v576_v50 }
 0x132   : > { %630 = vmatpush.bf16.msra.mxu1 %v575_v51  ;;  %1002 = vmatpush.bf16.msra.mxu3 %v575_v51 }
 0x136   : > { %631 = vmatpush.bf16.msra.mxu1 %v574_v53  ;;  %1003 = vmatpush.bf16.msra.mxu3 %v574_v53 }
 0x13a   : > { %632 = vmatpush.bf16.msra.mxu1 %v573_v54  ;;  %1004 = vmatpush.bf16.msra.mxu3 %v573_v54 }
 0x13e   : > { %633 = vmatpush.bf16.msra.mxu1 %v572_v55  ;;  %1005 = vmatpush.bf16.msra.mxu3 %v572_v55 }
 0x142   : > { %634 = vmatpush.bf16.msra.mxu1 %v571_v56  ;;  %1006 = vmatpush.bf16.msra.mxu3 %v571_v56 }
 0x145   : > { %635 = vmatmul.bf16.vlgmr.msra.gmra.mxu1 %v983_v57  ;;  %655 = vmatmul.bf16.vlgmr.msra.gmra.mxu3 %v987_v58 }
 0x155   : > { %640 = vmatmul.bf16.gmra.mxu1 %v984_v59  ;;  %660 = vmatmul.bf16.gmra.mxu3 %v988_v60 }
 0x165   : > { %645 = vmatmul.bf16.gmra.mxu1 %v985_v61  ;;  %665 = vmatmul.bf16.gmra.mxu3 %v989_v62 }
 0x175   : > { %650 = vmatmul.bf16.gmra.mxu1 %v986_v63  ;;  %670 = vmatmul.bf16.gmra.mxu3 %v990_v0 }
 0x1c2   : > { %v636_v2 = vpop.f32.mrf.mxu1 }
 0x1c3   : > { %v676_v3 = vadd.f32 %v636_v2, %v539_v1 }
 0x1c5   : > { %692 = vst [vmem:[#allocation2 + $0x30] sm:$0xff] %v676_v3 }
 0x1c8   : > { %v656_v5 = vpop.f32.mrf.mxu3 }
 0x1c9   : > { %v684_v7 = vadd.f32 %v656_v5, %v547_v4 }
 0x1ca   : > { %v638_v8 = vpop.f32.mrf.mxu1 }
 0x1cb   : > { %700 = vst [vmem:[#allocation2 + $0x40] sm:$0xff] %v684_v7  ;;  %v677_v9 = vadd.f32 %v638_v8, %v540_v6 }
 0x1cd   : > { %693 = vst [vmem:[#allocation2] sm:$0xff] %v677_v9 }
 0x1d0   : > { %v658_v11 = vpop.f32.mrf.mxu3 }
 0x1d1   : > { %v685_v13 = vadd.f32 %v658_v11, %v548_v10 }
 0x1d2   : > { %v641_v14 = vpop.f32.mrf.mxu1 }
 0x1d3   : > { %701 = vst [vmem:[#allocation2 + $0x20] sm:$0xff] %v685_v13  ;;  %v678_v15 = vadd.f32 %v641_v14, %v541_v12 }
 0x1d5   : > { %694 = vst [vmem:[#allocation2 + $0x58] sm:$0xff] %v678_v15 }
 0x1d8   : > { %v661_v17 = vpop.f32.mrf.mxu3 }
 0x1d9   : > { %v686_v19 = vadd.f32 %v661_v17, %v549_v16 }
 0x1da   : > { %v643_v20 = vpop.f32.mrf.mxu1 }
 0x1db   : > { %702 = vst [vmem:[#allocation2 + $0x10] sm:$0xff] %v686_v19  ;;  %v679_v21 = vadd.f32 %v643_v20, %v542_v18 }
 0x1dd   : > { %695 = vst [vmem:[#allocation2 + $0x18] sm:$0xff] %v679_v21 }
 0x1e0   : > { %v663_v23 = vpop.f32.mrf.mxu3 }
 0x1e1   : > { %v687_v25 = vadd.f32 %v663_v23, %v550_v22 }
 0x1e2   : > { %v646_v26 = vpop.f32.mrf.mxu1 }
 0x1e3   : > { %703 = vst [vmem:[#allocation2 + $0x38] sm:$0xff] %v687_v25  ;;  %v680_v27 = vadd.f32 %v646_v26, %v543_v24 }
 0x1e5   : > { %696 = vst [vmem:[#allocation2 + $0x50] sm:$0xff] %v680_v27 }
 0x1e8   : > { %v666_v29 = vpop.f32.mrf.mxu3 }
 0x1e9   : > { %v688_v31 = vadd.f32 %v666_v29, %v551_v28 }
 0x1ea   : > { %v648_v32 = vpop.f32.mrf.mxu1 }
 0x1eb   : > { %704 = vst [vmem:[#allocation2 + $0x60] sm:$0xff] %v688_v31  ;;  %v681_v33 = vadd.f32 %v648_v32, %v544_v30 }
 0x1ed   : > { %697 = vst [vmem:[#allocation2 + $0x68] sm:$0xff] %v681_v33 }
 0x1f0   : > { %v668_v35 = vpop.f32.mrf.mxu3 }
 0x1f1   : > { %v689_v37 = vadd.f32 %v668_v35, %v552_v34 }
 0x1f2   : > { %v651_v38 = vpop.f32.mrf.mxu1 }
 0x1f3   : > { %705 = vst [vmem:[#allocation2 + $0x70] sm:$0xff] %v689_v37  ;;  %v682_v39 = vadd.f32 %v651_v38, %v545_v36 }
 0x1f5   : > { %698 = vst [vmem:[#allocation2 + $0x8] sm:$0xff] %v682_v39 }
 0x1f8   : > { %v671_v41 = vpop.f32.mrf.mxu3 }
 0x1f9   : > { %v690_v43 = vadd.f32 %v671_v41, %v553_v40 }
 0x1fa   : > { %v653_v44 = vpop.f32.mrf.mxu1 }
 0x1fb   : > { %706 = vst [vmem:[#allocation2 + $0x78] sm:$0xff] %v690_v43  ;;  %v683_v45 = vadd.f32 %v653_v44, %v546_v42 }
 0x1fd   : > { %699 = vst [vmem:[#allocation2 + $0x48] sm:$0xff] %v683_v45 }
 0x1ff   : > { %711 = sbr.rel (%p963_p13) target bundleno = 535 (0x217), region = 85 }
 0x200   : > { %v673_v47 = vpop.f32.mrf.mxu3 }
 0x201   : > { %v691_v48 = vadd.f32 %v673_v47, %v554_v46 }
 0x203   : > { %707 = vst [vmem:[#allocation2 + $0x28] sm:$0xff] %v691_v48 }
 0x204   : > { %v712_v49 = vld [vmem:[#allocation2 + $0x30] sm:$0xff]  ;;  %v1064_v50 = vld [vmem:[%s1327_s3] ss:$0 sm:$0xff]  ;;  %v714_v52 = vld [vmem:[#allocation2 + $0x58] sm:$0xff] }
 0x205   : > { %v713_v51 = vld [vmem:[#allocation2] sm:$0xff]  ;;  %v715_v53 = vld [vmem:[#allocation2 + $0x18] sm:$0xff]  ;;  %v732_v54 = vadd.f32 %v1064_v50, %v712_v49  ;;  %v734_v56 = vadd.f32 %v1064_v50, %v714_v52  ;;  %v716_v57 = vld [vmem:[#allocation2 + $0x50] sm:$0xff] }
 0x206   : > { %v733_v55 = vadd.f32 %v1064_v50, %v713_v51  ;;  %v717_v58 = vld [vmem:[#allocation2 + $0x68] sm:$0xff]  ;;  %v735_v59 = vadd.f32 %v1064_v50, %v715_v53  ;;  %v736_v61 = vadd.f32 %v1064_v50, %v716_v57  ;;  %v720_v0 = vld [vmem:[#allocation2 + $0x40] sm:$0xff]  ;;  %v722_v4 = vld [vmem:[#allocation2 + $0x10] sm:$0xff] }
 0x207   : > { %v718_v60 = vld [vmem:[#allocation2 + $0x8] sm:$0xff]  ;;  %748 = vst [vmem:[%s1238_s7] sm:$0xff] %v732_v54  ;;  %v737_v63 = vadd.f32 %v1064_v50, %v717_v58  ;;  %v721_v2 = vld [vmem:[#allocation2 + $0x20] sm:$0xff]  ;;  %v740_v5 = vadd.f32 %v1064_v50, %v720_v0  ;;  %v723_v6 = vld [vmem:[#allocation2 + $0x38] sm:$0xff]  ;;  %v742_v9 = vadd.f32 %v1064_v50, %v722_v4 }
 0x208   : > { %v719_v62 = vld [vmem:[#allocation2 + $0x48] sm:$0xff]  ;;  %749 = vst [vmem:[%s1238_s7 + $0x8] sm:$0xff] %v733_v55  ;;  %v738_v1 = vadd.f32 %v1064_v50, %v718_v60  ;;  %v741_v7 = vadd.f32 %v1064_v50, %v721_v2  ;;  %v724_v8 = vld [vmem:[#allocation2 + $0x60] sm:$0xff]  ;;  %v725_v10 = vld [vmem:[#allocation2 + $0x70] sm:$0xff]  ;;  %v743_v11 = vadd.f32 %v1064_v50, %v723_v6 }
 0x209   : > { %750 = vst [vmem:[%s1238_s7 + $0x10] sm:$0xff] %v734_v56  ;;  %v739_v3 = vadd.f32 %v1064_v50, %v719_v62  ;;  %v726_v12 = vld [vmem:[#allocation2 + $0x78] sm:$0xff]  ;;  %v744_v13 = vadd.f32 %v1064_v50, %v724_v8  ;;  %v745_v15 = vadd.f32 %v1064_v50, %v725_v10 }
 0x20a   : > { %751 = vst [vmem:[%s1238_s7 + $0x18] sm:$0xff] %v735_v59  ;;  %v727_v14 = vld [vmem:[#allocation2 + $0x28] sm:$0xff]  ;;  %v746_v16 = vadd.f32 %v1064_v50, %v726_v12 }
 0x20b   : > { %752 = vst [vmem:[%s1238_s7 + $0x20] sm:$0xff] %v736_v61  ;;  %v747_v17 = vadd.f32 %v1064_v50, %v727_v14 }
 0x20c   : > { %753 = vst [vmem:[%s1238_s7 + $0x28] sm:$0xff] %v737_v63 }
 0x20d   : > { %754 = vst [vmem:[%s1238_s7 + $0x30] sm:$0xff] %v738_v1 }
 0x20e   : > { %755 = vst [vmem:[%s1238_s7 + $0x38] sm:$0xff] %v739_v3 }
 0x20f   : > { %756 = vst [vmem:[%s1238_s7 + $0x40] sm:$0xff] %v740_v5 }
 0x210   : > { %757 = vst [vmem:[%s1238_s7 + $0x48] sm:$0xff] %v741_v7 }
 0x211   : > { %758 = vst [vmem:[%s1238_s7 + $0x50] sm:$0xff] %v742_v9 }
 0x212   : > { %759 = vst [vmem:[%s1238_s7 + $0x58] sm:$0xff] %v743_v11 }
 0x213   : > { %760 = vst [vmem:[%s1238_s7 + $0x60] sm:$0xff] %v744_v13 }
 0x214   : > { %761 = vst [vmem:[%s1238_s7 + $0x68] sm:$0xff] %v745_v15 }
 0x215   : > { %762 = vst [vmem:[%s1238_s7 + $0x70] sm:$0xff] %v746_v16 }
 0x216   : > { %763 = vst [vmem:[%s1238_s7 + $0x78] sm:$0xff] %v747_v17 }
 0x217 PF: > { %s14_s21 = sadd.s32 1, %s1119_s21   ;;  %s1329_s15 = smov %s1099_s16 }
 0x218   : > { %p11_p0 = scmp.ge.s32.totalorder %s14_s21, 6   ;;  %s1330_s16 = smov %s1198_s28 }
 0x219   : > { %s1331_s17 = smov %s1111_s19  ;;  %s1332_s18 = smov %s1115_s20 }
 0x21a   : > { %s1333_s19 = smov %s1336_s22  ;;  %s1334_s20 = smov %s1340_s23 }
 0x21b   :  { %13 = sbr.rel (!%p11_p0) target bundleno = 4 (0x4), region = 123 }

</bundles_post_ra>
